<compile_context>
chip_gen: v5e
topology: v5e:2x2
jax: 0.10.0
libtpu: 0.0.40
codegen_flags: <defaults>
</compile_context>

<pallas_src>
import jax
import jax.numpy as jnp
import numpy as np
from jax import lax
from jax.experimental import pallas as pl
from jax.experimental.pallas import tpu as pltpu


# ----------------------------------------------------------------------------
# Shared gate math: one packed dot + single-tanh activation (i, f, g, o order)
# Requires w/b to be pre-scaled (i/f/o columns * 0.5) and scale/offset vectors
# scale = [.5,.5,1,.5]-pattern, offset = [.5,.5,0,.5]-pattern, each (1, 4H).
# ----------------------------------------------------------------------------
def _lstm_gate_math(xh, c, w, b, scale, offset, H):
    gates = jnp.dot(xh, w, preferred_element_type=jnp.float32) + b      # (B, 4H)
    t = jnp.tanh(gates)                       # one EUP pass over the full vreg
    act = t * scale + offset                  # sigmoid(i,f,o) / tanh(g) via identity
    i_g = act[:, 0 * H:1 * H]
    f_g = act[:, 1 * H:2 * H]
    g_g = act[:, 2 * H:3 * H]
    o_g = act[:, 3 * H:4 * H]
    c_new = f_g * c + i_g * g_g
    h_new = o_g * jnp.tanh(c_new)
    return h_new, c_new


# ----------------------------------------------------------------------------
# Single-step kernel: in-kernel concat into a VMEM slab + one fused dot
# ----------------------------------------------------------------------------
def _make_step_kernel(n_reads, H):
    def kernel(*args):
        # args: x, read_0..read_{n-1}, hc, w, b, scale, offset, hc_out, xh_scratch
        x_ref = args[0]
        read_refs = args[1:1 + n_reads]
        (hc_ref, w_ref, b_ref, s_ref, o_ref,
         hc_out_ref, xh_sc) = args[1 + n_reads:]

        h = hc_ref[:, :H]
        c = hc_ref[:, H:]

        # Pack [x | reads... | h] into the scratch slab (fused concat).
        off = 0
        for seg in (x_ref,) + tuple(read_refs):
            w_seg = seg.shape[1]
            xh_sc[:, off:off + w_seg] = seg[...]
            off += w_seg
        xh_sc[:, off:off + H] = h

        h_new, c_new = _lstm_gate_math(xh_sc[...], c, w_ref[...], b_ref[...],
                                       s_ref[...], o_ref[...], H)

        hc_out_ref[:, :H] = h_new.astype(hc_out_ref.dtype)
        hc_out_ref[:, H:] = c_new.astype(hc_out_ref.dtype)

    return kernel


@jax.jit
def lstm_step_pallas(x, reads, hc, w_gate, b_gate, act_scale, act_offset):
    """x: (B, x_dim); reads: tuple of (B, r_dim); hc: (B, 2H);
    w_gate: (K, 4H) pre-scaled; b_gate/act_scale/act_offset: (1, 4H)."""
    B = x.shape[0]
    H = hc.shape[1] // 2
    K = w_gate.shape[0]
    n_reads = len(reads)

    kernel = _make_step_kernel(n_reads, H)
    vmem = pl.BlockSpec(memory_space=pltpu.MemorySpace.VMEM)
    return pl.pallas_call(
        kernel,
        out_shape=jax.ShapeDtypeStruct((B, 2 * H), jnp.float32),
        in_specs=[vmem] * (n_reads + 6),
        out_specs=vmem,
        scratch_shapes=[pltpu.VMEM((B, K), jnp.float32)],
    )(x, *reads, hc, w_gate, b_gate, act_scale, act_offset)


# ----------------------------------------------------------------------------
# Sequence kernel: T timesteps in ONE pallas_call, h/c resident in VMEM
# ----------------------------------------------------------------------------
@jax.jit
def lstm_sequence_pallas(xcat_seq, hc0, w_gate, b_gate, act_scale, act_offset):
    """xcat_seq: (T, B, D_in); hc0: (B, 2H); returns hc_seq: (T, B, 2H)."""
    T, B, D_in = xcat_seq.shape
    H = hc0.shape[1] // 2
    K = w_gate.shape[0]
    G = 4 * H

    def kernel(xcat_ref, hc0_ref, w_ref, b_ref, s_ref, o_ref,
               hc_out_ref, hc_sc, xh_sc):
        @pl.when(pl.program_id(0) == 0)
        def _():
            hc_sc[...] = hc0_ref[...]

        h = hc_sc[:, :H]
        c = hc_sc[:, H:]
        xh_sc[:, :D_in] = xcat_ref[0]
        xh_sc[:, D_in:] = h

        h_new, c_new = _lstm_gate_math(xh_sc[...], c, w_ref[...], b_ref[...],
                                       s_ref[...], o_ref[...], H)

        hc_sc[:, :H] = h_new
        hc_sc[:, H:] = c_new
        hc_out_ref[0] = hc_sc[...]

    grid_spec = pltpu.PrefetchScalarGridSpec(
        num_scalar_prefetch=0,
        grid=(T,),
        in_specs=[
            pl.BlockSpec((1, B, D_in), lambda t: (t, 0, 0)),   # per-step input
            pl.BlockSpec((B, 2 * H), lambda t: (0, 0)),        # initial state (resident)
            pl.BlockSpec((K, G), lambda t: (0, 0)),            # weights (resident)
            pl.BlockSpec((1, G), lambda t: (0, 0)),            # bias (resident)
            pl.BlockSpec((1, G), lambda t: (0, 0)),            # act scale (resident)
            pl.BlockSpec((1, G), lambda t: (0, 0)),            # act offset (resident)
        ],
        out_specs=pl.BlockSpec((1, B, 2 * H), lambda t: (t, 0, 0)),
        scratch_shapes=[pltpu.VMEM((B, 2 * H), jnp.float32),   # h/c carry
                        pltpu.VMEM((B, K), jnp.float32)],      # packed [x|h] slab
    )
    return pl.pallas_call(
        kernel,
        out_shape=jax.ShapeDtypeStruct((T, B, 2 * H), jnp.float32),
        grid_spec=grid_spec,
        compiler_params=pltpu.CompilerParams(
            dimension_semantics=("arbitrary",)),
    )(xcat_seq, hc0, w_gate, b_gate, act_scale, act_offset)


# ----------------------------------------------------------------------------
# JAX Controller mirroring the PyTorch module
# ----------------------------------------------------------------------------
class Controller:
    def __init__(self, input_dim, ctrl_dim, output_dim, read_data_size, key):
        self.input_size = input_dim
        self.ctrl_dim = ctrl_dim
        self.output_size = output_dim
        self.read_data_size = read_data_size

        ks = jax.random.split(key, 8)
        H = ctrl_dim
        G = 4 * H
        # nn.LSTMCell default init: U(-1/sqrt(H), 1/sqrt(H))
        s = 1.0 / np.sqrt(H)
        self.w_ih = jax.random.uniform(ks[0], (G, input_dim), jnp.float32, -s, s)
        self.w_hh = jax.random.uniform(ks[1], (G, H), jnp.float32, -s, s)
        self.b_ih = jax.random.uniform(ks[2], (G,), jnp.float32, -s, s)
        self.b_hh = jax.random.uniform(ks[3], (G,), jnp.float32, -s, s)

        # Hoisted / packed gate parameters (computed ONCE, reused every step):
        #   W_cat = [W_ih^T ; W_hh^T]  -> (input_dim + H, 4H)
        #   b_cat = b_ih + b_hh        -> (1, 4H)
        w_cat = jnp.concatenate([self.w_ih.T, self.w_hh.T], axis=0)
        b_cat = (self.b_ih + self.b_hh).reshape(1, G)

        # Single-tanh activation trick: pre-scale i/f/o columns by 0.5 so that
        #   sigmoid(z) = 0.5 * tanh(z/2) + 0.5   and   tanh(z) for the g gate
        # come out of ONE tanh pass followed by a broadcast FMA.
        g_cols = np.zeros((1, G), np.float32)
        g_cols[:, 2 * H:3 * H] = 1.0
        col_scale = np.where(g_cols > 0, 1.0, 0.5).astype(np.float32)
        self.w_gate = w_cat * col_scale                        # (K, 4H)
        self.b_gate = b_cat * col_scale                        # (1, 4H)
        self.act_scale = jnp.asarray(col_scale)                # (1, 4H): 0.5 / 1.0
        self.act_offset = jnp.asarray(
            np.where(g_cols > 0, 0.0, 0.5).astype(np.float32))  # (1, 4H): 0.5 / 0.0

        # out_net: Linear(read_data_size, output_dim), kaiming_uniform_ weight
        bound_w = np.sqrt(6.0 / read_data_size)
        self.out_w = jax.random.uniform(ks[4], (output_dim, read_data_size),
                                        jnp.float32, -bound_w, bound_w)
        bound_b = 1.0 / np.sqrt(read_data_size)
        self.out_b = jax.random.uniform(ks[5], (output_dim,), jnp.float32,
                                        -bound_b, bound_b)

        # h_bias_fc / c_bias_fc: Linear(1, ctrl_dim); applied to [[0.0]] -> bias only
        sb = 1.0  # 1/sqrt(in_features=1)
        self.h_bias = jax.random.uniform(ks[6], (H,), jnp.float32, -sb, sb)
        self.c_bias = jax.random.uniform(ks[7], (H,), jnp.float32, -sb, sb)

        self.hc_state = None  # packed (B, 2H): [h | c]
        self.reset()

    # h/c views of the packed state (API compatibility with the PyTorch module)
    @property
    def h_state(self):
        return self.hc_state[:, :self.ctrl_dim]

    @property
    def c_state(self):
        return self.hc_state[:, self.ctrl_dim:]

    def reset(self, batch_size=1):
        h0 = jnp.broadcast_to(self.h_bias[None, :], (batch_size, self.ctrl_dim))
        c0 = jnp.broadcast_to(self.c_bias[None, :], (batch_size, self.ctrl_dim))
        self.hc_state = jnp.concatenate([h0, c0], axis=1)

    def forward(self, x, prev_reads):
        """One LSTMCell step (single fused Pallas kernel). Returns (h, c)."""
        self.hc_state = lstm_step_pallas(x, tuple(prev_reads), self.hc_state,
                                         self.w_gate, self.b_gate,
                                         self.act_scale, self.act_offset)
        return self.h_state, self.c_state

    def forward_sequence(self, x_seq, reads_seq):
        """Run T controller steps in ONE pallas_call (h/c stay in VMEM).
        x_seq: (T, B, x_dim); reads_seq: list of (T, B, r_dim).
        Returns (h_seq, c_seq) each (T, B, H)."""
        xcat_seq = jnp.concatenate([x_seq, *reads_seq], axis=-1)
        hc_seq = lstm_sequence_pallas(xcat_seq, self.hc_state,
                                      self.w_gate, self.b_gate,
                                      self.act_scale, self.act_offset)
        self.hc_state = hc_seq[-1]
        return hc_seq[:, :, :self.ctrl_dim], hc_seq[:, :, self.ctrl_dim:]

    def output(self, reads):
        """sigmoid(Linear(cat([h, *reads]))) -- small glue, plain JAX."""
        out_state = jnp.concatenate([self.h_state, *reads], axis=1)
        return jax.nn.sigmoid(out_state @ self.out_w.T + self.out_b)


# ----------------------------------------------------------------------------
# Pure-JAX references for correctness checking of the kernels
# ----------------------------------------------------------------------------
def lstm_cell_ref(x_cat, h, c, w_ih, w_hh, b_ih, b_hh):
    H = h.shape[1]
    gates = x_cat @ w_ih.T + h @ w_hh.T + b_ih + b_hh
    i = jax.nn.sigmoid(gates[:, 0 * H:1 * H])
    f = jax.nn.sigmoid(gates[:, 1 * H:2 * H])
    g = jnp.tanh(gates[:, 2 * H:3 * H])
    o = jax.nn.sigmoid(gates[:, 3 * H:4 * H])
    c_new = f * c + i * g
    h_new = o * jnp.tanh(c_new)
    return h_new, c_new


def lstm_seq_ref(xcat_seq, h0, c0, w_ih, w_hh, b_ih, b_hh):
    def step(carry, xcat):
        h, c = carry
        h, c = lstm_cell_ref(xcat, h, c, w_ih, w_hh, b_ih, b_hh)
        return (h, c), (h, c)
    _, (hs, cs) = lax.scan(step, (h0, c0), xcat_seq)
    return hs, cs


if __name__ == "__main__":
    key = jax.random.PRNGKey(0)
    k_param, k_x, k_r0, k_r1, k_xs, k_rs0, k_rs1 = jax.random.split(key, 7)

    # Small, forward-consistent shapes:
    batch = 2
    x_dim = 8
    read_dim = 12
    n_reads = 2
    input_dim = x_dim + n_reads * read_dim          # LSTMCell input size = 32
    ctrl_dim = 32
    output_dim = 8
    read_data_size = ctrl_dim + n_reads * read_dim  # for out_net
    seq_len = 8

    ctrl = Controller(input_dim, ctrl_dim, output_dim, read_data_size, k_param)
    ctrl.reset(batch_size=batch)

    x = jax.random.normal(k_x, (batch, x_dim), jnp.float32)
    prev_reads = [jax.random.normal(k_r0, (batch, read_dim), jnp.float32),
                  jax.random.normal(k_r1, (batch, read_dim), jnp.float32)]

    # --- single-step forward (fused Pallas kernel) -------------------------
    h0, c0 = np.asarray(ctrl.h_state), np.asarray(ctrl.c_state)
    h, c = ctrl.forward(x, prev_reads)
    jax.block_until_ready((h, c))

    x_cat = jnp.concatenate([x, *prev_reads], axis=1)
    h_ref, c_ref = lstm_cell_ref(x_cat, h0, c0,
                                 ctrl.w_ih, ctrl.w_hh, ctrl.b_ih, ctrl.b_hh)
    np.testing.assert_allclose(np.asarray(h), np.asarray(h_ref), rtol=1e-5, atol=1e-5)
    np.testing.assert_allclose(np.asarray(c), np.asarray(c_ref), rtol=1e-5, atol=1e-5)

    # --- sequence forward: T steps inside one pallas_call ------------------
    ctrl.reset(batch_size=batch)
    h0, c0 = ctrl.h_state, ctrl.c_state
    x_seq = jax.random.normal(k_xs, (seq_len, batch, x_dim), jnp.float32)
    reads_seq = [jax.random.normal(k_rs0, (seq_len, batch, read_dim), jnp.float32),
                 jax.random.normal(k_rs1, (seq_len, batch, read_dim), jnp.float32)]

    h_seq, c_seq = ctrl.forward_sequence(x_seq, reads_seq)
    jax.block_until_ready((h_seq, c_seq))

    xcat_seq = jnp.concatenate([x_seq, *reads_seq], axis=-1)
    hs_ref, cs_ref = lstm_seq_ref(xcat_seq, h0, c0,
                                  ctrl.w_ih, ctrl.w_hh, ctrl.b_ih, ctrl.b_hh)
    np.testing.assert_allclose(np.asarray(h_seq), np.asarray(hs_ref),
                               rtol=1e-5, atol=1e-5)
    np.testing.assert_allclose(np.asarray(c_seq), np.asarray(cs_ref),
                               rtol=1e-5, atol=1e-5)

    # Exercise output() path too (plain-JAX glue around the kernel state).
    out = ctrl.output(prev_reads)
    jax.block_until_ready(out)

    print("KERNEL_OK")
</pallas_src>

<mosaic_0001>
module attributes {stable_mosaic.version = 11 : i64} {
  func.func @kernel(%arg0: memref<2x8xf32, #tpu.memory_space<vmem>>, %arg1: memref<2x12xf32, #tpu.memory_space<vmem>>, %arg2: memref<2x12xf32, #tpu.memory_space<vmem>>, %arg3: memref<2x64xf32, #tpu.memory_space<vmem>>, %arg4: memref<64x128xf32, #tpu.memory_space<vmem>>, %arg5: memref<1x128xf32, #tpu.memory_space<vmem>>, %arg6: memref<1x128xf32, #tpu.memory_space<vmem>>, %arg7: memref<1x128xf32, #tpu.memory_space<vmem>>, %arg8: memref<2x64xf32, #tpu.memory_space<vmem>>, %arg9: memref<2x64xf32, #tpu.memory_space<vmem>>) attributes {dimension_semantics = [], scalar_prefetch = 0 : i64, scratch_operands = 1 : i64, tpu.core_type = #tpu.core_type<tc>} {
    %c0 = arith.constant 0 : index
    %c0_0 = arith.constant 0 : index
    %0 = vector.load %arg3[%c0, %c0_0] : memref<2x64xf32, #tpu.memory_space<vmem>>, vector<2x32xf32>
    %c0_1 = arith.constant 0 : index
    %c32 = arith.constant 32 : index
    %1 = vector.load %arg3[%c0_1, %c32] : memref<2x64xf32, #tpu.memory_space<vmem>>, vector<2x32xf32>
    %c0_2 = arith.constant 0 : index
    %c0_3 = arith.constant 0 : index
    %2 = vector.load %arg0[%c0_2, %c0_3] : memref<2x8xf32, #tpu.memory_space<vmem>>, vector<2x8xf32>
    %c0_4 = arith.constant 0 : index
    %c0_5 = arith.constant 0 : index
    %3 = vector.load %arg9[%c0_4, %c0_5] : memref<2x64xf32, #tpu.memory_space<vmem>>, vector<2x8xf32>
    tpu.vector_store %arg9[%c0_4, %c0_5], %2 {strides = array<i32>} : memref<2x64xf32, #tpu.memory_space<vmem>>, vector<2x8xf32>,
    %c0_6 = arith.constant 0 : index
    %c0_7 = arith.constant 0 : index
    %4 = vector.load %arg1[%c0_6, %c0_7] : memref<2x12xf32, #tpu.memory_space<vmem>>, vector<2x12xf32>
    %c0_8 = arith.constant 0 : index
    %c8 = arith.constant 8 : index
    %5 = vector.load %arg9[%c0_8, %c8] : memref<2x64xf32, #tpu.memory_space<vmem>>, vector<2x12xf32>
    tpu.vector_store %arg9[%c0_8, %c8], %4 {strides = array<i32>} : memref<2x64xf32, #tpu.memory_space<vmem>>, vector<2x12xf32>,
    %c0_9 = arith.constant 0 : index
    %c0_10 = arith.constant 0 : index
    %6 = vector.load %arg2[%c0_9, %c0_10] : memref<2x12xf32, #tpu.memory_space<vmem>>, vector<2x12xf32>
    %c0_11 = arith.constant 0 : index
    %c20 = arith.constant 20 : index
    %7 = vector.load %arg9[%c0_11, %c20] : memref<2x64xf32, #tpu.memory_space<vmem>>, vector<2x12xf32>
    tpu.vector_store %arg9[%c0_11, %c20], %6 {strides = array<i32>} : memref<2x64xf32, #tpu.memory_space<vmem>>, vector<2x12xf32>,
    %c0_12 = arith.constant 0 : index
    %c32_13 = arith.constant 32 : index
    %8 = vector.load %arg9[%c0_12, %c32_13] : memref<2x64xf32, #tpu.memory_space<vmem>>, vector<2x32xf32>
    tpu.vector_store %arg9[%c0_12, %c32_13], %0 {strides = array<i32>} : memref<2x64xf32, #tpu.memory_space<vmem>>, vector<2x32xf32>,
    %c0_14 = arith.constant 0 : index
    %c0_15 = arith.constant 0 : index
    %9 = vector.load %arg9[%c0_14, %c0_15] : memref<2x64xf32, #tpu.memory_space<vmem>>, vector<2x64xf32>
    %c0_16 = arith.constant 0 : index
    %c0_17 = arith.constant 0 : index
    %10 = vector.load %arg4[%c0_16, %c0_17] : memref<64x128xf32, #tpu.memory_space<vmem>>, vector<64x128xf32>
    %c0_18 = arith.constant 0 : index
    %c0_19 = arith.constant 0 : index
    %11 = vector.load %arg5[%c0_18, %c0_19] : memref<1x128xf32, #tpu.memory_space<vmem>>, vector<1x128xf32>
    %c0_20 = arith.constant 0 : index
    %c0_21 = arith.constant 0 : index
    %12 = vector.load %arg6[%c0_20, %c0_21] : memref<1x128xf32, #tpu.memory_space<vmem>>, vector<1x128xf32>
    %c0_22 = arith.constant 0 : index
    %c0_23 = arith.constant 0 : index
    %13 = vector.load %arg7[%c0_22, %c0_23] : memref<1x128xf32, #tpu.memory_space<vmem>>, vector<1x128xf32>
    %cst = arith.constant dense<0.000000e+00> : vector<2x128xf32>
    %14 = tpu.matmul %9, %10, %cst {dimension_numbers = #tpu.dot_dimension_numbers<[1], [0], [0], [1], [0, 0, 1, 1], [], []>} : vector<2x64xf32>, vector<64x128xf32>, vector<2x128xf32> -> vector<2x128xf32>
    %15 = vector.broadcast %11 : vector<1x128xf32> to vector<2x128xf32>
    %16 = arith.addf %14, %15 : vector<2x128xf32>
    %17 = math.tanh %16 : vector<2x128xf32>
    %18 = vector.broadcast %12 : vector<1x128xf32> to vector<2x128xf32>
    %19 = arith.mulf %17, %18 : vector<2x128xf32>
    %20 = vector.broadcast %13 : vector<1x128xf32> to vector<2x128xf32>
    %21 = arith.addf %19, %20 : vector<2x128xf32>
    %22 = vector.extract_strided_slice %21 {offsets = [0, 0], sizes = [2, 32], strides = [1, 1]} : vector<2x128xf32> to vector<2x32xf32>
    %23 = vector.extract_strided_slice %21 {offsets = [0, 32], sizes = [2, 32], strides = [1, 1]} : vector<2x128xf32> to vector<2x32xf32>
    %24 = vector.extract_strided_slice %21 {offsets = [0, 64], sizes = [2, 32], strides = [1, 1]} : vector<2x128xf32> to vector<2x32xf32>
    %25 = vector.extract_strided_slice %21 {offsets = [0, 96], sizes = [2, 32], strides = [1, 1]} : vector<2x128xf32> to vector<2x32xf32>
    %26 = arith.mulf %23, %1 : vector<2x32xf32>
    %27 = arith.mulf %22, %24 : vector<2x32xf32>
    %28 = arith.addf %26, %27 : vector<2x32xf32>
    %29 = math.tanh %28 : vector<2x32xf32>
    %30 = arith.mulf %25, %29 : vector<2x32xf32>
    %c0_24 = arith.constant 0 : index
    %c0_25 = arith.constant 0 : index
    %31 = vector.load %arg8[%c0_24, %c0_25] : memref<2x64xf32, #tpu.memory_space<vmem>>, vector<2x32xf32>
    tpu.vector_store %arg8[%c0_24, %c0_25], %30 {strides = array<i32>} : memref<2x64xf32, #tpu.memory_space<vmem>>, vector<2x32xf32>,
    %c0_26 = arith.constant 0 : index
    %c32_27 = arith.constant 32 : index
    %32 = vector.load %arg8[%c0_26, %c32_27] : memref<2x64xf32, #tpu.memory_space<vmem>>, vector<2x32xf32>
    tpu.vector_store %arg8[%c0_26, %c32_27], %28 {strides = array<i32>} : memref<2x64xf32, #tpu.memory_space<vmem>>, vector<2x32xf32>,
    return
  }
}

</mosaic_0001>

<bundles_post_ra>
// kernel: lstm_step_pallas.1
= control target key start
LH: loop header
LB: loop body
LE: loop exit
PB: predicated region body
PF: predicated region fallthrough
CT: control target
= control target key end

     0   :  { %13 = vsyncpa [#allocation4], 0  ;;  %s435_s0 = inlined_call_operand.hbm [shape: f32[2,8], index: 0, kind: input, shape index: {}]   ;;  %s436_s1 = inlined_call_operand.hbm [shape: f32[2,12], index: 1, kind: input, shape index: {}]   ;;  %s437_s2 = inlined_call_operand.hbm [shape: f32[2,12], index: 2, kind: input, shape index: {}]   ;;  %s438_s3 = inlined_call_operand.vmem [shape: f32[2,64], index: 3, kind: input, shape index: {}]   ;;  %s439_s4 = inlined_call_operand.hbm [shape: f32[64,128], index: 4, kind: input, shape index: {}]   ;;  %s440_s5 = inlined_call_operand.vmem [shape: f32[1,128], index: 5, kind: input, shape index: {}]   ;;  %s441_s6 = inlined_call_operand.vmem [shape: f32[1,128], index: 6, kind: input, shape index: {}]   ;;  %s442_s7 = inlined_call_operand.vmem [shape: f32[1,128], index: 7, kind: input, shape index: {}]   ;;  %s443_s8 = inlined_call_operand.hbm [shape: f32[2,64], index: 8, kind: output, shape index: {}]  }
   0x1   :  { %14 = vsyncpa [#allocation7], 0 }
   0x2   :  { %15 = vsyncpa [#allocation10], 0  ;;  %s33_s29 = sshll.u32 %s436_s1, 4  ;;  %s34_s29 = int_to_ptr.hbm [resolvable:$true] %s33_s29 }
   0x3   :  { %16 = vsyncpa [#allocation5], 0  ;;  %s348_s30 = smov [#allocation6]   ;;  %s22_s12 = sshll.u32 %s435_s0, 4  ;;  %s23_s12 = int_to_ptr.hbm [resolvable:$true] %s22_s12 }
   0x4   :  { %s35_s9 = sshll.u32 %s348_s30, 4  ;;  %s349_s13 = smov [#allocation3]   ;;  %s36_s9 = int_to_ptr.vmem [resolvable:$true] %s35_s9 }
   0x5   :  { %38 = dma.hbm_to_vmem [thread:$0]  %s34_s29, 32, %s36_s9, [#allocation7]  }
   0x6   :  { %s24_s14 = sshll.u32 %s349_s13, 4  ;;  %s44_s17 = sshll.u32 %s437_s2, 4  ;;  %s25_s14 = int_to_ptr.vmem [resolvable:$true] %s24_s14  ;;  %s45_s17 = int_to_ptr.hbm [resolvable:$true] %s44_s17 }
   0x7   :  { %27 = dma.hbm_to_vmem [thread:$0]  %s23_s12, 32, %s25_s14, [#allocation4]  }
   0x8   :  { %s56_s19 = sshll.u32 %s439_s4, 4  ;;  %s350_s20 = smov [#allocation8]   ;;  %s57_s19 = int_to_ptr.hbm [resolvable:$true] %s56_s19 }
   0x9   :  { %s46_s21 = sshll.u32 %s350_s20, 4  ;;  %s351_s0 = smov [#allocation9]   ;;  %s47_s21 = int_to_ptr.vmem [resolvable:$true] %s46_s21 }
   0xa   :  { %49 = dma.hbm_to_vmem [thread:$0]  %s45_s17, 32, %s47_s21, [#allocation7]  }
   0xb   :  { %s58_s22 = sshll.u32 %s351_s0, 4  ;;  %s352_s23 = smov 128   ;;  %s59_s22 = int_to_ptr.vmem [resolvable:$true] %s58_s22 }
   0xc   :  { %s353_s24 = smov 8  }
   0xd   :  { %64 = dma.hbm_to_vmem [thread:$0]  %s57_s19, 1024, %s59_s22, [#allocation10], %s352_s23, %s352_s23, %s353_s24  }
   0xe   :  { %340 = dma.done.wait [#allocation4], 32  }
   0xf   :  { %341 = vsyncadd [#allocation4], 4294967264 }
  0x10   :  { %342 = dma.done.wait [#allocation7], 64  }
  0x11   :  { %343 = vsyncadd [#allocation7], 4294967232 }
  0x12   :  { %344 = dma.done.wait [#allocation10], 1024  }
  0x13   :  { %345 = vsyncadd [#allocation10], 4294966272  ;;  %v91_v0 = vld [vmem:[#allocation6] sm:$0x3]  ;;  %v87_v1 = vld [vmem:[%s438_s3] sm:$0x3] }
  0x14   :  { %93 = vrot.lane.b32.xlu0 %v91_v0, %s353_s24  ;;  %s354_s25 = smov 32   ;;  %v98_v2 = vld [vmem:[#allocation8] sm:$0x3]  ;;  %s355_s26 = smov 20   ;;  %vm89_vm0 = vcmask 58368   ;;  %v118_v5 = vld [vmem:[#allocation9 + $0x30] sm:$0xff] }
  0x15   :  { %106 = vrot.lane.b32.xlu1 %v87_v1, %s354_s25  ;;  %v88_v3 = vld [vmem:[#allocation3] sm:$0x3]  ;;  %v117_v6 = vld [vmem:[#allocation9 + $0x28] sm:$0xff]  ;;  %v116_v7 = vld [vmem:[#allocation9 + $0x20] sm:$0xff]  ;;  %vm96_vm1 = vcmask 156736   ;;  %vm103_vm2 = vcmask 255136  }
  0x16   :  { %90 = vst.msk [vmem:[#allocation2] sm:$0x3] %vm89_vm0, %v88_v3  ;;  %v119_v4 = vld [vmem:[#allocation9 + $0x38] sm:$0xff]  ;;  %v114_v9 = vld [vmem:[#allocation9 + $0x10] sm:$0xff]  ;;  %v113_v10 = vld [vmem:[#allocation9 + $0x8] sm:$0xff]  ;;  %vm109_vm3 = vcmask 517376  }
  0x17   :  { %138 = vmatpush.msra.mxu0 %v119_v4  ;;  %v115_v8 = vld [vmem:[#allocation9 + $0x18] sm:$0xff]  ;;  %v112_v11 = vld [vmem:[#allocation9] sm:$0xff]  ;;  %vm126_vm4 = vcmask 523264   ;;  %s356_s10 = smov 64   ;;  %s190_s12 = sshll.u32 %s443_s8, 4  ;;  %vm180_vm5 = vcmask 254976   ;;  %s191_s12 = int_to_ptr.hbm [resolvable:$true] %s190_s12 }
  0x18   :  { %v213_v16 = vld [vmem:[%s440_s5] ss:$0 sm:$0xff]  ;;  %s357_s5 = smov [#allocation11]  }
  0x19   :  { %139 = vmatpush.msra.mxu0 %v118_v5  ;;  %v214_v19 = vld [vmem:[%s441_s6] ss:$0 sm:$0xff]  ;;  %s188_s6 = sshll.u32 %s357_s5, 4  ;;  %s189_s6 = int_to_ptr.vmem [resolvable:$true] %s188_s6 }
  0x1a   :  { %v215_v20 = vld [vmem:[%s442_s7] ss:$0 sm:$0xff] }
  0x1b   :  { %140 = vmatpush.msra.mxu0 %v117_v6 }
  0x1c   :  { %100 = vrot.lane.b32.xlu0 %v98_v2, %s355_s26 }
  0x1d   :  { %141 = vmatpush.msra.mxu0 %v116_v7 }
  0x1f   :  { %142 = vmatpush.msra.mxu0 %v115_v8 }
  0x21   :  { %143 = vmatpush.msra.mxu0 %v114_v9 }
  0x23   :  { %144 = vmatpush.msra.mxu0 %v113_v10 }
  0x25   :  { %145 = vmatpush.msra.mxu0 %v112_v11 }
  0x86   :  { %v94_v12 = vpop.permute.xlu0 %93 }
  0x87   :  { %97 = vst.msk [vmem:[#allocation2] sm:$0x3] %vm96_vm1, %v94_v12  ;;  %v107_v13 = vpop.permute.xlu1 %106 }
  0x8e   :  { %v101_v14 = vpop.permute.xlu0 %100 }
  0x8f   :  { %104 = vst.msk [vmem:[#allocation2] sm:$0x3] %vm103_vm2, %v101_v14 }
  0x90   :  { %110 = vst.msk [vmem:[#allocation2] sm:$0x3] %vm109_vm3, %v107_v13 }
  0x97   :  { %v111_v15 = vld [vmem:[#allocation2] sm:$0x3] }
  0x98   :  { %202 = vmatmul.msk.f32.vlgmr.msra.gmra.mxu0 %vm126_vm4, %v111_v15 }
 0x115   :  { %v147_v17 = vpop.f32.mrf.mxu0 }
 0x116   :  { %v148_v18 = vadd.f32 %v213_v16, %v147_v17 }
 0x118   :  { %216 = vtanh.f32 %v148_v18 }
 0x11e   :  { %v217_v21 = vpop.eup %216 }
 0x11f   :  { %v154_v22 = vmul.f32 %v217_v21, %v214_v19 }
 0x121   :  { %v158_v23 = vadd.f32 %v215_v20, %v154_v22 }
 0x123   :  { %161 = vrot.lane.b32.xlu1 %v158_v23, %s356_s10  ;;  %v159_v26 = vmul.f32 %v158_v23, %v87_v1 }
 0x195   :  { %v162_v24 = vpop.permute.xlu1 %161 }
 0x196   :  { %v164_v25 = vmul.f32 %v162_v24, %v158_v23 }
 0x198   :  { %166 = vrot.lane.b32.xlu2 %v164_v25, %s354_s25 }
 0x1f2   :  { %v167_v27 = vpop.permute.xlu2 %166 }
 0x1f3   :  { %v169_v28 = vadd.f32 %v167_v27, %v159_v26 }
 0x1f5   :  { %218 = vtanh.f32 %v169_v28 }
 0x1fb   :  { %v219_v29 = vpop.eup %218 }
 0x1fc   :  { %172 = vrot.lane.b32.xlu2 %v219_v29, %s356_s10 }
 0x256   :  { %v173_v30 = vpop.permute.xlu2 %172 }
 0x257   :  { %v175_v31 = vmul.f32 %v173_v30, %v158_v23 }
 0x259   :  { %177 = vrot.lane.b32.xlu0 %v175_v31, %s354_s25 }
 0x2cb   :  { %v178_v32 = vpop.permute.xlu0 %177 }
 0x2cc   :  { %181 = vst.msk [vmem:[#allocation11] sm:$0x3] %vm180_vm5, %v178_v32 }
 0x2cd   :  { %182 = vst.msk [vmem:[#allocation11] sm:$0x3] %vm109_vm3, %v169_v28 }
 0x2ce   :  { %193 = dma.vmem_to_hbm [thread:$0]  %s189_s6, 32, %s191_s12, [#allocation5]  }
 0x2cf   :  { %346 = dma.done.wait [#allocation5], 32  }
 0x2d0   :  { %347 = vsyncadd [#allocation5], 4294967264 }
 0x2d1   :  { %198 = vsyncpa [#allocation4], 1 }
 0x2d2   :  { %199 = vsyncpa [#allocation7], 1 }
 0x2d3   :  { %200 = vsyncpa [#allocation10], 1 }
 0x2d4   :  { %201 = vsyncpa [#allocation5], 1 }

</bundles_post_ra>
